<compile_context>
chip_gen: v5e
topology: v5e:2x2
jax: 0.10.0
libtpu: 0.0.40
codegen_flags: <defaults>
</compile_context>

<pallas_src>
import functools

import jax
import jax.numpy as jnp
from jax.experimental import pallas as pl
from jax.experimental.pallas import tpu as pltpu

D = 1024   # fixed by nn.Linear(1024, 1024) in the reference module
TN = 512   # output-feature tile for the gamma/beta (Linear) kernel (grid = 2)


# ----------------------------- kernels ------------------------------------- #
def _gamma_beta_kernel(m_mean_ref, std_ref, wm_ref, bm_ref, ws_ref, bs_ref, gb_ref):
    """One output-feature tile of:
         gamma = std_in @ Ws_t + bs      (row 0 of gb)
         beta  = m_mean @ Wm_t + bm      (row 1 of gb)
    m_mean / std_in are precomputed [1, D] vectors; the kernel is a pure bf16
    weight stream + MXU dot (f32 accumulation).  Runs only when the running
    statistics change (result is cached between updates).
    """
    ws = ws_ref[...].astype(jnp.float32)
    wm = wm_ref[...].astype(jnp.float32)
    gamma = (jnp.dot(std_ref[...], ws, preferred_element_type=jnp.float32)
             + bs_ref[...].astype(jnp.float32))
    beta = (jnp.dot(m_mean_ref[...], wm, preferred_element_type=jnp.float32)
            + bm_ref[...].astype(jnp.float32))
    gb_ref[...] = jnp.concatenate([gamma, beta], axis=0)   # one unmasked store


def _modulate_kernel(gb_ref, style_ref, out_ref):
    """Hot inference path: out = gamma * style + beta (pure elementwise, row-tiled)."""
    gamma = gb_ref[0:1, :]
    beta = gb_ref[1:2, :]
    out_ref[...] = gamma * style_ref[...] + beta


def _update_first_kernel(style_ref, m_out_ref, s_out_ref):
    """n == 1: m = style ; s = (style - mean(style, 0))**2."""
    style = style_ref[...]
    m_out_ref[...] = style
    d = style - jnp.mean(style, axis=0, keepdims=True)
    s_out_ref[...] = d * d


def _update_kernel(scale_ref, style_ref, m_ref, s_ref, m_out_ref, s_out_ref):
    """n > 1 Welford-style running-statistics update, in place via aliasing.

    scale_ref = [w / n, w] in SMEM (precomputed f32 on host).
    """
    w_over_n = scale_ref[0]
    w = scale_ref[1]
    style = style_ref[...]
    m = m_ref[...]
    prev_m = jnp.mean(m, axis=0, keepdims=True)
    m_new = m + (style - m) * w_over_n
    curr_m = jnp.mean(m_new, axis=0, keepdims=True)
    m_out_ref[...] = m_new
    s_out_ref[...] = s_ref[...] + w * (style - prev_m) * (style - curr_m)


# ----------------------------- wrappers ------------------------------------ #
_VMEM = pl.BlockSpec(memory_space=pltpu.MemorySpace.VMEM)   # whole array in VMEM
_SMEM = pl.BlockSpec(memory_space=pltpu.MemorySpace.SMEM)   # small scalar in SMEM


@jax.jit
def dst_gamma_beta(inv_n, m, s, wm_t, bm, ws_t, bs):
    """Compute stacked [gamma; beta] = the two Linear layers, tiled over output feats."""
    _, d = m.shape
    # Hoisted per-feature reductions: tiny fused XLA ops, done once per recompute.
    m_mean = jnp.mean(m, axis=0, keepdims=True)                      # [1, D] f32
    std_in = jnp.sqrt(jnp.mean(s, axis=0, keepdims=True) * inv_n)    # [1, D] f32
    grid = (d // TN,)
    return pl.pallas_call(
        _gamma_beta_kernel,
        out_shape=jax.ShapeDtypeStruct((2, d), jnp.float32),         # [gamma; beta]
        grid=grid,
        in_specs=[
            pl.BlockSpec((1, d), lambda j: (0, 0)),     # m_mean (resident)
            pl.BlockSpec((1, d), lambda j: (0, 0)),     # std_in (resident)
            pl.BlockSpec((d, TN), lambda j: (0, j)),    # Wm_t tile (bf16)
            pl.BlockSpec((1, TN), lambda j: (0, j)),    # bm tile   (bf16)
            pl.BlockSpec((d, TN), lambda j: (0, j)),    # Ws_t tile (bf16)
            pl.BlockSpec((1, TN), lambda j: (0, j)),    # bs tile   (bf16)
        ],
        out_specs=pl.BlockSpec((2, TN), lambda j: (0, j)),
        compiler_params=pltpu.CompilerParams(
            dimension_semantics=("parallel",),          # shard weight tiles over TCs
        ),
    )(m_mean, std_in, wm_t, bm, ws_t, bs)


@jax.jit
def dst_modulate(gb, style):
    """out = gamma * style + beta, row-tiled so it scales past small B."""
    B, d = style.shape
    tb = 512 if (B > 512 and B % 512 == 0) else B       # static under jit
    grid = (B // tb,)
    return pl.pallas_call(
        _modulate_kernel,
        out_shape=jax.ShapeDtypeStruct((B, d), style.dtype),
        grid=grid,
        in_specs=[
            pl.BlockSpec((2, d), lambda i: (0, 0)),     # gamma/beta (resident)
            pl.BlockSpec((tb, d), lambda i: (i, 0)),    # style row tile
        ],
        out_specs=pl.BlockSpec((tb, d), lambda i: (i, 0)),
        compiler_params=pltpu.CompilerParams(
            dimension_semantics=("parallel",),
        ),
    )(gb, style)


@jax.jit
def dst_update_first(style):
    shp = jax.ShapeDtypeStruct(style.shape, style.dtype)
    return pl.pallas_call(
        _update_first_kernel,
        out_shape=(shp, shp),
        in_specs=[_VMEM],
        out_specs=(_VMEM, _VMEM),
    )(style)


@functools.partial(jax.jit, donate_argnums=(2, 3))
def dst_update(scale, style, m, s):
    # TODO(synk): if B ever scales to thousands of rows, tile over rows with a
    # two-pass (or scratch-accumulator) scheme for the axis-0 means instead of
    # whole-array VMEM residency (matters first on v7x's 32 MiB scoped budget).
    shp = jax.ShapeDtypeStruct(style.shape, style.dtype)
    return pl.pallas_call(
        _update_kernel,
        out_shape=(shp, shp),
        in_specs=[_SMEM, _VMEM, _VMEM, _VMEM],
        out_specs=(_VMEM, _VMEM),
        input_output_aliases={2: 0, 3: 1},   # m -> m_out, s -> s_out (in place)
    )(scale, style, m, s)


class DomainStyleTransfer:
    """JAX/Pallas port of the PyTorch Domain_Style_Transfer module.

    gamma/beta only change when `update=True` is called, so they are computed
    lazily (once per update) by `dst_gamma_beta` and cached as a stacked [2, D]
    array; the per-call inference path is the tiny elementwise `dst_modulate`
    kernel.  The batch size B is assumed constant per target across update
    calls (same implicit assumption as the PyTorch module).
    """

    def __init__(self, datasets, key):
        self.n, self.m, self.s = {}, {}, {}
        self.params = {}
        self._gb, self._dirty = {}, {}
        self.w = 1.0
        bound = 1.0 / (D ** 0.5)   # PyTorch nn.Linear default init bound
        for dset in datasets:
            self.n[dset] = 0
            self.m[dset] = None
            self.s[dset] = None
            self._gb[dset] = None
            self._dirty[dset] = True
            key, k1, k2, k3, k4 = jax.random.split(key, 5)
            self.params[dset] = dict(
                # stored pre-transposed [in, out] and in bf16 (halves HBM stream);
                # kernels cast to f32 and accumulate in f32 on the MXU.
                wm_t=jax.random.uniform(k1, (D, D), jnp.float32, -bound, bound
                                        ).astype(jnp.bfloat16),
                bm=jax.random.uniform(k2, (1, D), jnp.float32, -bound, bound
                                      ).astype(jnp.bfloat16),
                ws_t=jax.random.uniform(k3, (D, D), jnp.float32, -bound, bound
                                        ).astype(jnp.bfloat16),
                bs=jax.random.uniform(k4, (1, D), jnp.float32, -bound, bound
                                      ).astype(jnp.bfloat16),
            )

    def forward(self, style, target, update=False):
        if update:
            self.n[target] += 1
            if self.n[target] == 1:
                m_new, s_new = dst_update_first(style)
            else:
                scale = jnp.array([self.w / self.n[target], self.w], jnp.float32)
                m_new, s_new = dst_update(scale, style, self.m[target], self.s[target])
            self.m[target], self.s[target] = m_new, s_new
            self._dirty[target] = True          # cached gamma/beta now stale
            return None
        else:
            if self.n[target] < 1:
                raise ValueError(
                    f"No statistics accumulated for target '{target}' (n == 0).")
            if self._dirty[target]:
                p = self.params[target]
                inv_n = jnp.float32(1.0 / self.n[target])
                self._gb[target] = dst_gamma_beta(
                    inv_n, self.m[target], self.s[target],
                    p["wm_t"], p["bm"], p["ws_t"], p["bs"])
                self._dirty[target] = False
            return dst_modulate(self._gb[target], style)


# ----------------------------- reference (plain JAX) ------------------------ #
def _ref_update(n, w, style, m, s):
    if n == 1:
        m_new = style
        s_new = (style - jnp.mean(style, axis=0, keepdims=True)) ** 2
    else:
        prev = jnp.mean(m, axis=0, keepdims=True)
        m_new = m + w * (style - m) / n
        curr = jnp.mean(m_new, axis=0, keepdims=True)
        s_new = s + w * (style - prev) * (style - curr)
    return m_new, s_new


def _ref_infer(n, style, m, s, p):
    wm = p["wm_t"].astype(jnp.float32)
    bm = p["bm"].astype(jnp.float32)
    ws = p["ws_t"].astype(jnp.float32)
    bs = p["bs"].astype(jnp.float32)
    beta = jnp.mean(m, axis=0, keepdims=True) @ wm + bm
    gamma = jnp.sqrt(jnp.mean(s, axis=0, keepdims=True) / n) @ ws + bs
    return gamma * style + beta


if __name__ == "__main__":
    key = jax.random.PRNGKey(0)
    key, k_model, k_style = jax.random.split(key, 3)

    B = 4  # small batch; feature dim fixed at 1024 by the module's Linear layers
    model = DomainStyleTransfer(["photo"], k_model)

    # statistics-update passes (update=True branch) + plain-JAX reference recursion
    ref_m = ref_s = None
    for step in range(3):
        key, kb = jax.random.split(key)
        batch = jax.random.normal(kb, (B, D), jnp.float32) * 2.0 + 0.5
        model.forward(batch, "photo", update=True)
        ref_m, ref_s = _ref_update(step + 1, model.w, batch, ref_m, ref_s)

    assert jnp.allclose(model.m["photo"], ref_m, atol=1e-4, rtol=1e-4), "m mismatch"
    assert jnp.allclose(model.s["photo"], ref_s, atol=1e-4, rtol=1e-4), "s mismatch"

    # inference passes (update=False branch); second call reuses cached gamma/beta
    style = jax.random.normal(k_style, (B, D), jnp.float32)
    out = jax.block_until_ready(model.forward(style, "photo", update=False))
    out2 = jax.block_until_ready(model.forward(style, "photo", update=False))

    ref = _ref_infer(model.n["photo"], style, ref_m, ref_s, model.params["photo"])
    assert out.shape == (B, D)
    assert jnp.allclose(out, ref, atol=1e-3, rtol=1e-3), "mismatch vs reference"
    assert jnp.allclose(out2, ref, atol=1e-3, rtol=1e-3), "cached path mismatch"

    # one more update -> cache invalidated -> gamma/beta recomputed on next infer
    key, kb = jax.random.split(key)
    batch = jax.random.normal(kb, (B, D), jnp.float32) - 0.25
    model.forward(batch, "photo", update=True)
    ref_m, ref_s = _ref_update(4, model.w, batch, ref_m, ref_s)
    out3 = jax.block_until_ready(model.forward(style, "photo", update=False))
    ref3 = _ref_infer(model.n["photo"], style, ref_m, ref_s, model.params["photo"])
    assert jnp.allclose(out3, ref3, atol=1e-3, rtol=1e-3), "post-update infer mismatch"

    print("KERNEL_OK")
</pallas_src>

<mosaic_0001>
module attributes {stable_mosaic.version = 11 : i64} {
  func.func @_update_first_kernel(%arg0: memref<4x1024xf32, #tpu.memory_space<vmem>>, %arg1: memref<4x1024xf32, #tpu.memory_space<vmem>>, %arg2: memref<4x1024xf32, #tpu.memory_space<vmem>>) attributes {dimension_semantics = [], scalar_prefetch = 0 : i64, scratch_operands = 0 : i64, tpu.core_type = #tpu.core_type<tc>} {
    %c0 = arith.constant 0 : index
    %c0_0 = arith.constant 0 : index
    %0 = vector.load %arg0[%c0, %c0_0] : memref<4x1024xf32, #tpu.memory_space<vmem>>, vector<4x1024xf32>
    %c0_1 = arith.constant 0 : index
    %c0_2 = arith.constant 0 : index
    %1 = vector.load %arg1[%c0_1, %c0_2] : memref<4x1024xf32, #tpu.memory_space<vmem>>, vector<4x1024xf32>
    tpu.vector_store %arg1[%c0_1, %c0_2], %0 {strides = array<i32>} : memref<4x1024xf32, #tpu.memory_space<vmem>>, vector<4x1024xf32>,
    %cst = arith.constant dense<0.000000e+00> : vector<1024xf32>
    %2 = vector.multi_reduction <add>, %0, %cst [0] : vector<4x1024xf32> to vector<1024xf32>
    %3 = vector.shape_cast %2 : vector<1024xf32> to vector<1x1024xf32>
    %cst_3 = arith.constant 4.000000e+00 : f32
    %4 = vector.broadcast %cst_3 : f32 to vector<1x1024xf32>
    %5 = arith.divf %3, %4 : vector<1x1024xf32>
    %6 = vector.broadcast %5 : vector<1x1024xf32> to vector<4x1024xf32>
    %7 = arith.subf %0, %6 : vector<4x1024xf32>
    %8 = arith.mulf %7, %7 : vector<4x1024xf32>
    %c0_4 = arith.constant 0 : index
    %c0_5 = arith.constant 0 : index
    %9 = vector.load %arg2[%c0_4, %c0_5] : memref<4x1024xf32, #tpu.memory_space<vmem>>, vector<4x1024xf32>
    tpu.vector_store %arg2[%c0_4, %c0_5], %8 {strides = array<i32>} : memref<4x1024xf32, #tpu.memory_space<vmem>>, vector<4x1024xf32>,
    return
  }
}

</mosaic_0001>

<bundles_post_ra>
// kernel: dst_update_first.1
= control target key start
LH: loop header
LB: loop body
LE: loop exit
PB: predicated region body
PF: predicated region fallthrough
CT: control target
= control target key end

     0   :  { %8 = vsyncpa [#allocation3], 0  ;;  %s352_s0 = inlined_call_operand.hbm [shape: f32[4,1024], index: 0, kind: input, shape index: {}]   ;;  %s353_s1 = inlined_call_operand.hbm [shape: f32[4,1024], index: 1, kind: output, shape index: {0}]   ;;  %s354_s2 = inlined_call_operand.hbm [shape: f32[4,1024], index: 2, kind: output, shape index: {1}]  }
   0x1   :  { %9 = vsyncpa [#allocation4], 0 }
   0x2   :  { %10 = vsyncpa [#allocation7], 0  ;;  %s16_s11 = sshll.u32 %s352_s0, 4  ;;  %s282_s12 = smov [#allocation2]   ;;  %s17_s11 = int_to_ptr.hbm [resolvable:$true] %s16_s11 }
   0x3   :  { %s18_s13 = sshll.u32 %s282_s12, 4  ;;  %s19_s13 = int_to_ptr.vmem [resolvable:$true] %s18_s13 }
   0x4   :  { %21 = dma.hbm_to_vmem [thread:$0]  %s17_s11, 512, %s19_s13, [#allocation3]  }
   0x5   :  { %276 = dma.done.wait [#allocation3], 512  }
   0x6   :  { %277 = vsyncadd [#allocation3], 4294966784  ;;  %v283_v0 = vmov 4.0   ;;  %v304_v2 = vld [vmem:[#allocation2] sm:$0xff]  ;;  %v306_v3 = vld [vmem:[#allocation2 + $0x8] sm:$0xff]  ;;  %s284_s0 = smov [#allocation5]  }
   0x7   :  { %202 = vrcp.f32 %v283_v0  ;;  %38 = vst [vmem:[#allocation1] ss:$2 sm:$0xff] %v304_v2  ;;  %v310_v5 = vld [vmem:[#allocation2 + $0x10] sm:$0xff]  ;;  %s170_s14 = sshll.u32 %s284_s0, 4  ;;  %s172_s17 = sshll.u32 %s353_s1, 4  ;;  %v317_v7 = vld [vmem:[#allocation2 + $0x18] sm:$0xff]  ;;  %s171_s14 = int_to_ptr.vmem [resolvable:$true] %s170_s14  ;;  %s173_s17 = int_to_ptr.hbm [resolvable:$true] %s172_s17 }
   0x8   :  { %30 = vst [vmem:[#allocation5] sm:$0xff] %v304_v2  ;;  %vm61_vm0 = vcmask 1043456   ;;  %s285_s1 = smov [#allocation6]   ;;  %s183_s21 = sshll.u32 %s354_s2, 4  ;;  %s184_s21 = int_to_ptr.hbm [resolvable:$true] %s183_s21 }
   0x9   :  { %40 = vst [vmem:[#allocation1 + $0x10] ss:$2 sm:$0xff] %v306_v3  ;;  %s181_s18 = sshll.u32 %s285_s1, 4  ;;  %s182_s18 = int_to_ptr.vmem [resolvable:$true] %s181_s18 }
   0xa   :  { %31 = vst [vmem:[#allocation5 + $0x8] sm:$0xff] %v306_v3 }
   0xb   :  { %42 = vst [vmem:[#allocation1 + $0x20] ss:$2 sm:$0xff] %v310_v5 }
   0xc   :  { %32 = vst [vmem:[#allocation5 + $0x10] sm:$0xff] %v310_v5 }
   0xd   :  { %v203_v1 = vpop.eup %202  ;;  %44 = vst [vmem:[#allocation1 + $0x30] ss:$2 sm:$0xff] %v317_v7 }
   0xe   :  { %v119_v4 = vmul.f32 4.0, %v203_v1  ;;  %33 = vst [vmem:[#allocation5 + $0x18] sm:$0xff] %v317_v7  ;;  %v45_v9 = vld.sshfl [vmem:[#allocation1] sm:$0xff pattern:$0x75316420]  ;;  %vm123_vm1 = vweird.f32 %v203_v1 }
   0xf   :  { %v46_v10 = vld.sshfl [vmem:[#allocation1 + $0x8] sm:$0xff pattern:$0x75316420]  ;;  %v62_v11 = vsel %vm61_vm0, %v45_v9, 0.0  ;;  %175 = dma.vmem_to_hbm [thread:$0]  %s171_s14, 512, %s173_s17, [#allocation4]  }
  0x10   :  { %v120_v6 = vsub.f32 1.0, %v119_v4  ;;  %v63_v13 = vrot.slane %v62_v11, 4  ;;  %v69_v14 = vsel %vm61_vm0, %v46_v10, 0.0  ;;  %v47_v15 = vld.sshfl [vmem:[#allocation1 + $0x10] sm:$0xff pattern:$0x75316420] }
  0x11   :  { %v70_v16 = vrot.slane %v69_v14, 4  ;;  %v48_v17 = vld.sshfl [vmem:[#allocation1 + $0x18] sm:$0xff pattern:$0x75316420]  ;;  %v76_v18 = vsel %vm61_vm0, %v47_v15, 0.0 }
  0x12   :  { %v121_v8 = vmul.f32 %v203_v1, %v120_v6  ;;  %v64_v19 = vadd.f32 %v63_v13, %v62_v11  ;;  %v77_v20 = vrot.slane %v76_v18, 4  ;;  %v83_v21 = vsel %vm61_vm0, %v48_v17, 0.0  ;;  %v49_v22 = vld.sshfl [vmem:[#allocation1 + $0x20] sm:$0xff pattern:$0x75316420] }
  0x13   :  { %v71_v23 = vadd.f32 %v70_v16, %v69_v14  ;;  %v84_v25 = vrot.slane %v83_v21, 4  ;;  %v50_v26 = vld.sshfl [vmem:[#allocation1 + $0x28] sm:$0xff pattern:$0x75316420]  ;;  %v90_v27 = vsel %vm61_vm0, %v49_v22, 0.0 }
  0x14   :  { %v122_v12 = vadd.f32 %v203_v1, %v121_v8  ;;  %v65_v28 = vrot.slane %v64_v19, 2  ;;  %v78_v29 = vadd.f32 %v77_v20, %v76_v18  ;;  %v91_v30 = vrot.slane %v90_v27, 4  ;;  %v51_v32 = vld.sshfl [vmem:[#allocation1 + $0x30] sm:$0xff pattern:$0x75316420] }
  0x15   :  { %v97_v31 = vsel %vm61_vm0, %v50_v26, 0.0  ;;  %v72_v33 = vrot.slane %v71_v23, 2  ;;  %v85_v34 = vadd.f32 %v84_v25, %v83_v21  ;;  %v52_v36 = vld.sshfl [vmem:[#allocation1 + $0x38] sm:$0xff pattern:$0x75316420]  ;;  %v104_v37 = vsel %vm61_vm0, %v51_v32, 0.0 }
  0x16   :  { %v327_v24 = vsel %vm123_vm1, %v203_v1, %v122_v12  ;;  %v98_v35 = vrot.slane %v97_v31, 4  ;;  %v66_v38 = vadd.f32 %v65_v28, %v64_v19  ;;  %v79_v39 = vrot.slane %v78_v29, 2 }
  0x17   :  { %v92_v40 = vadd.f32 %v91_v30, %v90_v27  ;;  %v105_v41 = vrot.slane %v104_v37, 4  ;;  %v73_v42 = vadd.f32 %v72_v33, %v71_v23  ;;  %v86_v43 = vrot.slane %v85_v34, 2 }
  0x18   :  { %v99_v44 = vadd.f32 %v98_v35, %v97_v31  ;;  %v111_v45 = vsel %vm61_vm0, %v52_v36, 0.0  ;;  %v67_v46 = vrot.slane %v66_v38, 1  ;;  %v80_v47 = vadd.f32 %v79_v39, %v78_v29 }
  0x19   :  { %v93_v48 = vrot.slane %v92_v40, 2  ;;  %v106_v49 = vadd.f32 %v105_v41, %v104_v37  ;;  %v74_v50 = vrot.slane %v73_v42, 1  ;;  %v87_v51 = vadd.f32 %v86_v43, %v85_v34 }
  0x1a   :  { %v100_v52 = vrot.slane %v99_v44, 2  ;;  %v112_v53 = vrot.slane %v111_v45, 4  ;;  %v68_v54 = vadd.f32 %v67_v46, %v66_v38  ;;  %v81_v55 = vrot.slane %v80_v47, 1 }
  0x1b   :  { %v94_v56 = vadd.f32 %v93_v48, %v92_v40  ;;  %v107_v57 = vrot.slane %v106_v49, 2  ;;  %v75_v58 = vadd.f32 %v74_v50, %v73_v42  ;;  %v88_v59 = vrot.slane %v87_v51, 1 }
  0x1c   :  { %v101_v60 = vadd.f32 %v100_v52, %v99_v44  ;;  %v113_v61 = vadd.f32 %v112_v53, %v111_v45  ;;  %v82_v62 = vadd.f32 %v81_v55, %v80_v47  ;;  %v125_v9 = vmul.f32 %v327_v24, %v68_v54 }
  0x1d   :  { %v95_v63 = vrot.slane %v94_v56, 1  ;;  %v108_v0 = vadd.f32 %v107_v57, %v106_v49  ;;  %v126_v1 = vmul.f32 %v327_v24, %v75_v58  ;;  %v89_v4 = vadd.f32 %v88_v59, %v87_v51 }
  0x1e   :  { %v102_v6 = vrot.slane %v101_v60, 1  ;;  %v114_v8 = vrot.slane %v113_v61, 2  ;;  %v127_v16 = vmul.f32 %v327_v24, %v82_v62 }
  0x1f   :  { %v96_v10 = vadd.f32 %v95_v63, %v94_v56  ;;  %v109_v11 = vrot.slane %v108_v0, 1  ;;  %v141_v12 = vrot.slane %v126_v1, 4  ;;  %v128_v13 = vmul.f32 %v327_v24, %v89_v4 }
  0x20   :  { %v103_v14 = vadd.f32 %v102_v6, %v101_v60  ;;  %v115_v15 = vadd.f32 %v114_v8, %v113_v61 }
  0x21   :  { %v145_v17 = vsel %vm61_vm0, %v125_v9, %v141_v12  ;;  %v142_v18 = vrot.slane %v128_v13, 4  ;;  %v129_v22 = vmul.f32 %v327_v24, %v96_v10  ;;  %v110_v26 = vadd.f32 %v109_v11, %v108_v0 }
  0x22   :  { %v130_v19 = vmul.f32 %v327_v24, %v103_v14  ;;  %v116_v20 = vrot.slane %v115_v15, 1  ;;  %v153_v21 = vsub.f32 %v304_v2, %v145_v17 }
  0x23   :  { %v146_v23 = vsel %vm61_vm0, %v127_v16, %v142_v18  ;;  %v131_v2 = vmul.f32 %v327_v24, %v110_v26 }
  0x24   :  { %v143_v25 = vrot.slane %v130_v19, 4  ;;  %v117_v27 = vadd.f32 %v116_v20, %v115_v15  ;;  %v157_v28 = vmul.f32 %v153_v21, %v153_v21  ;;  %v154_v29 = vsub.f32 %v306_v3, %v146_v23 }
  0x26   :  { %v147_v30 = vsel %vm61_vm0, %v129_v22, %v143_v25  ;;  %v132_v31 = vmul.f32 %v327_v24, %v117_v27  ;;  %161 = vst [vmem:[#allocation6] sm:$0xff] %v157_v28  ;;  %v158_v32 = vmul.f32 %v154_v29, %v154_v29 }
  0x27   :  { %v155_v33 = vsub.f32 %v310_v5, %v147_v30 }
  0x28   :  { %v144_v34 = vrot.slane %v132_v31, 4  ;;  %162 = vst [vmem:[#allocation6 + $0x8] sm:$0xff] %v158_v32 }
  0x29   :  { %v159_v35 = vmul.f32 %v155_v33, %v155_v33 }
  0x2a   :  { %v148_v36 = vsel %vm61_vm0, %v131_v2, %v144_v34 }
  0x2b   :  { %163 = vst [vmem:[#allocation6 + $0x10] sm:$0xff] %v159_v35  ;;  %v156_v3 = vsub.f32 %v317_v7, %v148_v36 }
  0x2d   :  { %v160_v37 = vmul.f32 %v156_v3, %v156_v3 }
  0x2f   :  { %164 = vst [vmem:[#allocation6 + $0x18] sm:$0xff] %v160_v37 }
  0x30   :  { %186 = dma.vmem_to_hbm [thread:$0]  %s182_s18, 512, %s184_s21, [#allocation7]  }
  0x31   :  { %278 = dma.done.wait [#allocation4], 512  }
  0x32   :  { %279 = vsyncadd [#allocation4], 4294966784 }
  0x33   :  { %280 = dma.done.wait [#allocation7], 512  }
  0x34   :  { %281 = vsyncadd [#allocation7], 4294966784 }
  0x35   :  { %195 = vsyncpa [#allocation3], 1 }
  0x36   :  { %196 = vsyncpa [#allocation4], 1 }
  0x37   :  { %197 = vsyncpa [#allocation7], 1 }

</bundles_post_ra>
